<compile_context>
chip_gen: v6e
topology: v6e:2x2x1
jax: 0.10.0
libtpu: 0.0.40
codegen_flags: <defaults>
</compile_context>

<pallas_src>
import functools

import jax
import jax.numpy as jnp
from jax.experimental import pallas as pl
from jax.experimental.pallas import tpu as pltpu


def _act_quant_kernel(x_ref, o_ref, *, a_bit: int):
    # Load in native dtype, do the math in f32, store back in native dtype.
    # Operation order matches the torch module exactly.
    x = x_ref[...].astype(jnp.float32)
    xc = jnp.clip(x, 0.0, 6.0)
    if a_bit == 32:
        o_ref[...] = xc.astype(o_ref.dtype)
    else:
        n = float(2 ** a_bit)
        q = jnp.clip(jnp.round((xc / 6.0) * n), -n, n - 1.0)
        o_ref[...] = ((q / n) * 6.0).astype(o_ref.dtype)


def _round_up(a: int, m: int) -> int:
    return -(-a // m) * m


def activation_quantize_fn_test(x: jax.Array, a_bit: int = 4) -> jax.Array:
    """Pallas TPU implementation of dacsdc/quant_dorefa.activation_quantize_fn_test."""
    assert a_bit <= 8 or a_bit == 32
    orig_shape = x.shape
    dtype = x.dtype
    total = int(x.size)
    elem_bytes = jnp.dtype(dtype).itemsize

    # Sublane-packing multiple for the second-minor axis (f32: 8, bf16: 16, int8/fp8: 32)
    # keeps block-edge stores full-width / unmasked for packed dtypes.
    sub = 8 if elem_bytes >= 4 else (16 if elem_bytes == 2 else 32)

    # --- lane-dense 2-D staging shape --------------------------------------------
    # Largest multiple-of-128 divisor of the flat length (capped at 8192) -> no padding.
    lanes = None
    max_lanes = min(8192, (total // 128) * 128)
    for cand in range(max_lanes, 127, -128):
        if total % cand == 0:
            lanes = cand
            break

    padded = total
    if lanes is None:
        # Rare ragged case (flat size not a multiple of 128): pad the tail.
        # TODO(synk): handle the ragged tail with a masked last block inside the kernel
        # instead of a pad + slice round-trip through HBM.
        lanes = 512 if total >= 512 else 128
        padded = _round_up(total, lanes)

    x_flat = x.reshape(-1)
    if padded != total:
        x_flat = jnp.pad(x_flat, (0, padded - total))
    rows = padded // lanes
    x2d = x_flat.reshape(rows, lanes)

    # --- tiling --------------------------------------------------------------------
    row_bytes = lanes * elem_bytes
    array_bytes = rows * row_bytes
    MIN_PIPELINE_BYTES = 1 << 20   # below this, one block: pipeline overhead > benefit
    TARGET_BLOCK_BYTES = 8 << 20   # ~8 MiB blocks: per-step overhead ~6-7% even at v7x's
                                   # 3.2 TB/s; 2x(in+out) buffering stays < 64 MiB VMEM.

    if array_bytes <= MIN_PIPELINE_BYTES or rows <= sub:
        tile_r = rows              # full extent -> always a legal block shape
    else:
        # >= 2 steps so HBM read of step i+1 overlaps writeback of step i-1; keep the
        # step count even so the "parallel" axis splits evenly across v7x's two TCs.
        steps = max(2, pl.cdiv(array_bytes, TARGET_BLOCK_BYTES))
        if steps % 2:
            steps += 1
        tile_r = min(rows, _round_up(pl.cdiv(rows, steps), sub))
        g = pl.cdiv(rows, tile_r)
        if g > 1 and g % 2 == 1:
            # Nudge to an even, balanced step count if sublane rounding made it odd.
            alt = _round_up(pl.cdiv(rows, g + 1), sub)
            if sub <= alt < rows and pl.cdiv(rows, alt) % 2 == 0:
                tile_r = alt
    grid = pl.cdiv(rows, tile_r)

    flops_per_elem = 2 if a_bit == 32 else 8
    cost = pl.CostEstimate(
        flops=flops_per_elem * padded,
        transcendentals=0,
        bytes_accessed=2 * padded * elem_bytes,   # memory-bound: one read + one write
    )

    # NOTE: input_output_aliases={0: 0} was deliberately NOT added: in eager use the
    # staging array may alias the caller's buffer / force a defensive copy, which would
    # add a full HBM pass on this bandwidth-bound op for zero wall-clock gain.
    out2d = pl.pallas_call(
        functools.partial(_act_quant_kernel, a_bit=a_bit),
        out_shape=jax.ShapeDtypeStruct((rows, lanes), dtype),
        grid_spec=pltpu.PrefetchScalarGridSpec(
            num_scalar_prefetch=0,
            grid=(grid,),
            in_specs=[pl.BlockSpec((tile_r, lanes), lambda i: (i, 0))],
            out_specs=pl.BlockSpec((tile_r, lanes), lambda i: (i, 0)),
        ),
        compiler_params=pltpu.CompilerParams(
            dimension_semantics=("parallel",),
            vmem_limit_bytes=48 << 20,
        ),
        cost_estimate=cost,
    )(x2d)

    out = out2d.reshape(-1)
    if padded != total:
        out = out[:total]
    return out.reshape(orig_shape)


def _reference(x, a_bit):
    xf = x.astype(jnp.float32)
    xc = jnp.clip(xf, 0.0, 6.0)
    if a_bit == 32:
        out = xc
    else:
        n = float(2 ** a_bit)
        out = (jnp.clip(jnp.round((xc / 6.0) * n), -n, n - 1.0) / n) * 6.0
    return out.astype(x.dtype)


if __name__ == "__main__":
    key = jax.random.PRNGKey(0)
    k1, k2, k3 = jax.random.split(key, 3)

    # NCHW input like the PyTorch module would see from a conv stack.
    x = jax.random.uniform(k1, (2, 4, 16, 16), dtype=jnp.float32, minval=-2.0, maxval=8.0)

    # a_bit = 4 quantization path (small input -> single-block path).
    y = jax.block_until_ready(activation_quantize_fn_test(x, a_bit=4))
    assert y.shape == x.shape and y.dtype == x.dtype
    assert jnp.allclose(y, _reference(x, 4), atol=1e-6), "mismatch vs reference (a_bit=4)"

    # a_bit = 32 path (pure clamp).
    y32 = jax.block_until_ready(activation_quantize_fn_test(x, a_bit=32))
    assert jnp.allclose(y32, _reference(x, 32), atol=1e-6), "mismatch vs reference (a_bit=32)"

    # Native bf16 path stays bf16 through HBM (f32 math only inside the kernel).
    xb = x.astype(jnp.bfloat16)
    yb = jax.block_until_ready(activation_quantize_fn_test(xb, a_bit=4))
    assert yb.dtype == jnp.bfloat16
    assert jnp.allclose(yb.astype(jnp.float32),
                        _reference(xb, 4).astype(jnp.float32), atol=1e-6)

    # Ragged flat size (exercises the pad fallback path).
    xr = jax.random.uniform(k2, (3, 5, 7, 11), dtype=jnp.float32, minval=-2.0, maxval=8.0)
    yr = jax.block_until_ready(activation_quantize_fn_test(xr, a_bit=4))
    assert jnp.allclose(yr, _reference(xr, 4), atol=1e-6), "mismatch vs reference (ragged)"

    # Larger activation (exercises the multi-step pipelined / dual-TC grid path).
    xl = jax.random.uniform(k3, (16, 32, 32, 32), dtype=jnp.float32, minval=-2.0, maxval=8.0)
    yl = jax.block_until_ready(activation_quantize_fn_test(xl, a_bit=4))
    assert jnp.allclose(yl, _reference(xl, 4), atol=1e-6), "mismatch vs reference (large)"

    print("KERNEL_OK")
</pallas_src>

<mosaic_0001>
module attributes {stable_mosaic.version = 11 : i64} {
  func.func @_act_quant_kernel(%arg0: i32, %arg1: memref<1x2048xf32, #tpu.memory_space<vmem>>, %arg2: memref<1x2048xf32, #tpu.memory_space<vmem>>) attributes {dimension_semantics = [#tpu.dimension_semantics<parallel>], iteration_bounds = array<i64: 1>, scalar_prefetch = 0 : i64, scratch_operands = 0 : i64, tpu.core_type = #tpu.core_type<tc>, window_params = [{transform_indices = @transform_0, window_bounds = array<i64: 1, 2048>}, {transform_indices = @transform_1, window_bounds = array<i64: 1, 2048>}]} {
    %c0 = arith.constant 0 : index
    %c0_0 = arith.constant 0 : index
    %0 = vector.load %arg1[%c0, %c0_0] : memref<1x2048xf32, #tpu.memory_space<vmem>>, vector<1x2048xf32>
    %cst = arith.constant 0.000000e+00 : f32
    %cst_1 = arith.constant 6.000000e+00 : f32
    %1 = vector.broadcast %cst : f32 to vector<1x2048xf32>
    %2 = arith.maximumf %1, %0 : vector<1x2048xf32>
    %3 = vector.broadcast %cst_1 : f32 to vector<1x2048xf32>
    %4 = arith.minimumf %3, %2 : vector<1x2048xf32>
    %cst_2 = arith.constant 6.000000e+00 : f32
    %5 = vector.broadcast %cst_2 : f32 to vector<1x2048xf32>
    %6 = arith.divf %4, %5 : vector<1x2048xf32>
    %cst_3 = arith.constant 1.600000e+01 : f32
    %7 = vector.broadcast %cst_3 : f32 to vector<1x2048xf32>
    %8 = arith.mulf %6, %7 : vector<1x2048xf32>
    %9 = math.roundeven %8 : vector<1x2048xf32>
    %cst_4 = arith.constant -1.600000e+01 : f32
    %cst_5 = arith.constant 1.500000e+01 : f32
    %10 = vector.broadcast %cst_4 : f32 to vector<1x2048xf32>
    %11 = arith.maximumf %10, %9 : vector<1x2048xf32>
    %12 = vector.broadcast %cst_5 : f32 to vector<1x2048xf32>
    %13 = arith.minimumf %12, %11 : vector<1x2048xf32>
    %cst_6 = arith.constant 1.600000e+01 : f32
    %14 = vector.broadcast %cst_6 : f32 to vector<1x2048xf32>
    %15 = arith.divf %13, %14 : vector<1x2048xf32>
    %cst_7 = arith.constant 6.000000e+00 : f32
    %16 = vector.broadcast %cst_7 : f32 to vector<1x2048xf32>
    %17 = arith.mulf %15, %16 : vector<1x2048xf32>
    %c0_8 = arith.constant 0 : index
    %c0_9 = arith.constant 0 : index
    %18 = vector.load %arg2[%c0_8, %c0_9] : memref<1x2048xf32, #tpu.memory_space<vmem>>, vector<1x2048xf32>
    tpu.vector_store %arg2[%c0_8, %c0_9], %17 {strides = array<i32>} : memref<1x2048xf32, #tpu.memory_space<vmem>>, vector<1x2048xf32>,
    return
  }
  func.func @transform_0(%arg0: i32) -> (i32, i32) {
    %c0_i32 = arith.constant 0 : i32
    %c0_i32_0 = arith.constant 0 : i32
    return %arg0, %c0_i32 : i32, i32
  }
  func.func @transform_1(%arg0: i32) -> (i32, i32) {
    %c0_i32 = arith.constant 0 : i32
    %c0_i32_0 = arith.constant 0 : i32
    return %arg0, %c0_i32 : i32, i32
  }
}

</mosaic_0001>

<bundles_post_ra>
// kernel: tpu_custom_call.1
= control target key start
LH: loop header
LB: loop body
LE: loop exit
PB: predicated region body
PF: predicated region fallthrough
CT: control target
= control target key end

     0   :  { %6 = vsyncpa [#allocation3], 0  ;;  %s140_s0 = inlined_call_operand.hbm [shape: f32[1,2048], index: 0, kind: input, shape index: {}]   ;;  %s141_s1 = inlined_call_operand.hbm [shape: f32[1,2048], index: 1, kind: output, shape index: {}]  }
   0x1   :  { %7 = vsyncpa [#allocation4], 0  ;;  %s122_s6 = smov [#allocation2]  }
   0x2   :  { %s14_s7 = sshll.u32 %s122_s6, 4  ;;  %s15_s7 = int_to_ptr.vmem [resolvable:$true] %s14_s7 }
   0x3   :  { %s86_s8 = scalar_lea.vmem %s15_s7, 256  ;;  %p91_p1 = scmp.lt.s32.totalorder %s15_s7, %s15_s7 }
   0x4   :  { %p87_p0 = scmp.ne.s32.totalorder %s15_s7, %s86_s8  ;;  %p92_p2 = scmp.lt.s32.totalorder %s86_s8, %s86_s8 }
   0x6   :  { %p93_p3 = por %p92_p2, %p91_p1 }
   0x8   :  { %p94_p4 = pnand %p93_p3, %p87_p0 }
   0xa   :  { %97 = shalt.err (!%p94_p4)
}
   0xb   :  { %17 = dma.hbm_to_vmem [thread:$0]  %s140_s0, 256, %s15_s7, [#allocation3]  }
   0xc   :  { %118 = dma.done.wait [#allocation3], 256  }
   0xd   :  { %119 = vsyncadd [#allocation3], 4294967040  ;;  %v21_v0 = vld [vmem:[#allocation2] sm:$0xff]  ;;  %v22_v1 = vld [vmem:[#allocation2 + $0x8] sm:$0xff]  ;;  %s123_s0 = smov [#allocation5]  }
   0xe   :  { %v23_v2 = vmax.f32 %v21_v0, 0.0  ;;  %v24_v3 = vmax.f32 %v22_v1, 0.0  ;;  %s51_s11 = sshll.u32 %s123_s0, 4  ;;  %s52_s11 = int_to_ptr.vmem [resolvable:$true] %s51_s11 }
   0xf   :  { %s98_s12 = scalar_lea.vmem %s52_s11, 256  ;;  %p103_p6 = scmp.lt.s32.totalorder %s52_s11, %s52_s11 }
  0x10   :  { %v25_v4 = vmin.f32 %v23_v2, 6.0  ;;  %v26_v5 = vmin.f32 %v24_v3, 6.0  ;;  %p99_p5 = scmp.ne.s32.totalorder %s52_s11, %s98_s12  ;;  %p104_p7 = scmp.lt.s32.totalorder %s98_s12, %s98_s12 }
  0x12   :  { %v28_v6 = vmul.f32 0.16666667, %v25_v4  ;;  %v29_v7 = vmul.f32 0.16666667, %v26_v5  ;;  %p105_p8 = por %p104_p7, %p103_p6 }
  0x14   :  { %v30_v8 = vmul.f32 16.0, %v28_v6  ;;  %v31_v9 = vmul.f32 16.0, %v29_v7  ;;  %p106_p9 = pnand %p105_p8, %p99_p5 }
  0x16   :  { %v62_v10 = vcvt.f32.s32 %v30_v8  ;;  %v60_v11 = vand.u32 2147483647, %v30_v8  ;;  %v70_v12 = vcvt.f32.s32 %v31_v9  ;;  %v65_v14 = vand.u32 2147483648, %v30_v8 }
  0x17   :  { %v68_v15 = vand.u32 2147483647, %v31_v9  ;;  %v73_v17 = vand.u32 2147483648, %v31_v9 }
  0x18   :  { %v63_v13 = vcvt.s32.f32 %v62_v10  ;;  %v71_v16 = vcvt.s32.f32 %v70_v12  ;;  %vm61_vm0 = vcmp.lt.f32.partialorder %v60_v11, 8388608.0 }
  0x19   :  { %vm69_vm1 = vcmp.lt.f32.partialorder %v68_v15, 8388608.0 }
  0x1a   :  { %v64_v18 = vand.u32 2147483647, %v63_v13  ;;  %v72_v19 = vand.u32 2147483647, %v71_v16 }
  0x1c   :  { %v66_v20 = vor.u32 %v65_v14, %v64_v18  ;;  %v74_v21 = vor.u32 %v73_v17, %v72_v19 }
  0x1e   :  { %v67_v22 = vsel %vm61_vm0, %v66_v20, %v30_v8  ;;  %v75_v24 = vsel %vm69_vm1, %v74_v21, %v31_v9 }
  0x1f   :  { %v34_v23 = vmax.f32 %v67_v22, -16.0  ;;  %v35_v25 = vmax.f32 %v75_v24, -16.0 }
  0x21   :  { %v36_v26 = vmin.f32 %v34_v23, 15.0  ;;  %v37_v27 = vmin.f32 %v35_v25, 15.0 }
  0x23   :  { %v39_v28 = vmul.f32 0.0625, %v36_v26  ;;  %v40_v29 = vmul.f32 0.0625, %v37_v27 }
  0x25   :  { %v41_v30 = vmul.f32 6.0, %v39_v28  ;;  %v42_v31 = vmul.f32 6.0, %v40_v29 }
  0x27   :  { %43 = vst [vmem:[#allocation5] sm:$0xff] %v41_v30  ;;  %44 = vst [vmem:[#allocation5 + $0x8] sm:$0xff] %v42_v31 }
  0x28   :  { %109 = shalt.err (!%p106_p9)
}
  0x29   :  { %54 = dma.vmem_to_hbm [thread:$0]  %s52_s11, 256, %s141_s1, [#allocation4]  }
  0x2a   :  { %120 = dma.done.wait [#allocation4], 256  }
  0x2b   :  { %121 = vsyncadd [#allocation4], 4294967040 }
  0x2c   :  { %58 = vsyncpa [#allocation3], 1 }
  0x2d   :  { %59 = vsyncpa [#allocation4], 1 }

</bundles_post_ra>
